<compile_context>
chip_gen: v6e
topology: v6e:2x2x1
jax: 0.10.0
libtpu: 0.0.40
codegen_flags: <defaults>
</compile_context>

<pallas_src>
import jax
import jax.numpy as jnp
from jax.experimental import pallas as pl
from jax.experimental.pallas import tpu as pltpu


PADW = 128  # lane-dense output width: cols [0:P] = logits, col PADW-1 = per-example loss


# ---------------------------------------------------------------------------
# Pallas kernel: 2x GraphConvolution -> masked mean over aspect tokens ->
#                linear classifier -> per-example cross-entropy
# GraphConvolution(adj, x): relu((adj @ (x @ W)) / (sum(adj, -1) + 1) + b)
# ---------------------------------------------------------------------------
def cdt_kernel(x_ref, adj_ref, mask_ref, alen_ref, lbl_ref,      # per-batch-tile inputs
               w1_ref, b1_ref, w2_ref, b2_ref, wp_ref, bp_ref,   # resident weights
               out_ref):                                         # packed (TB, 128) output
    TB, L, D2 = x_ref.shape
    H = w1_ref.shape[1]
    padw = out_ref.shape[1]

    adj = adj_ref[...]                                           # (TB, L, L)

    # Normalize the adjacency once: (adj @ h) / (deg + 1) == (adj * 1/(deg+1)) @ h.
    denom = jnp.sum(adj, axis=2, keepdims=True) + 1.0            # (TB, L, 1)
    adj_n = adj * pl.reciprocal(denom, approx=False)             # (TB, L, L)

    # ----- GCN layer 1: collapse (TB, L) tokens into one MXU-friendly matmul -----
    h = jnp.dot(x_ref[...].reshape(TB * L, D2), w1_ref[...],
                preferred_element_type=jnp.float32)              # (TB*L, H)
    h = jnp.einsum('bij,bjh->bih', adj_n, h.reshape(TB, L, H),
                   preferred_element_type=jnp.float32) + b1_ref[...]
    h = jnp.maximum(h, 0.0)                                      # (TB, L, H)

    # ----- GCN layer 2 -----
    h = jnp.dot(h.reshape(TB * L, H), w2_ref[...],
                preferred_element_type=jnp.float32)              # (TB*L, H)
    h = jnp.einsum('bij,bjh->bih', adj_n, h.reshape(TB, L, H),
                   preferred_element_type=jnp.float32) + b2_ref[...]
    h = jnp.maximum(h, 0.0)                                      # (TB, L, H)

    # ----- masked mean over aspect tokens (VPU multiply + sublane reduce) -----
    gsum = jnp.sum(h * mask_ref[...], axis=1)                    # (TB, H)
    gave = gsum * pl.reciprocal(alen_ref[...], approx=False)     # (TB, H)

    # ----- classifier into a lane-dense, 128-wide padded slab -----
    pred = jnp.dot(gave, wp_ref[...],
                   preferred_element_type=jnp.float32) + bp_ref[...]   # (TB, PADW)

    # ----- per-example cross-entropy (padded cols have bias -1e30 -> exp()==0) -----
    m = jnp.max(pred, axis=-1, keepdims=True)
    lse = m + jnp.log(jnp.sum(jnp.exp(pred - m), axis=-1, keepdims=True))  # (TB, 1)
    col = jax.lax.broadcasted_iota(jnp.int32, (TB, padw), 1)
    picked = jnp.sum(jnp.where(col == lbl_ref[...], pred, 0.0),
                     axis=-1, keepdims=True)                     # (TB, 1)
    loss = lse - picked                                          # (TB, 1)

    # one unmasked lane-dense store: logits in cols [0:P], per-example loss in last col
    out_ref[...] = jnp.where(col == padw - 1, loss, pred)


def cdt_bert_extract_term(batch_embedding, adj, extract_mask, aspect_len, labels,
                          w1, b1, w2, b2, wp, bp, *, tb=8):
    B, L, D2 = batch_embedding.shape
    H = w1.shape[1]
    P = wp.shape[1]
    assert B % tb == 0, "batch must be divisible by the per-step batch tile"
    assert P < PADW

    # Layout plumbing (done once in the wrapper; keeps the kernel lane-dense).
    mask_col = extract_mask.reshape(B, L, 1).astype(jnp.float32)           # (B, L, 1)
    alen = aspect_len.reshape(B, 1).astype(jnp.float32)                    # (B, 1)
    lbls = labels.reshape(B, 1).astype(jnp.int32)                          # (B, 1)
    wp_pad = jnp.zeros((H, PADW), jnp.float32).at[:, :P].set(wp)           # (H, 128)
    bp_pad = jnp.full((1, PADW), -1e30, jnp.float32).at[:, :P].set(bp)     # (1, 128)

    flops = B * (2 * L * D2 * H + 2 * L * L * H
                 + 2 * L * H * H + 2 * L * L * H
                 + 2 * H * PADW + 8 * L * H)
    bytes_accessed = 4 * (B * L * D2 + B * L * L + B * L + 2 * B
                          + D2 * H + H + H * H + H + H * PADW + PADW + B * PADW)
    cost = pl.CostEstimate(flops=flops,
                           transcendentals=B * (PADW + 1),
                           bytes_accessed=bytes_accessed)

    grid_spec = pltpu.PrefetchScalarGridSpec(
        num_scalar_prefetch=0,
        grid=(B // tb,),
        in_specs=[
            pl.BlockSpec((tb, L, D2), lambda b: (b, 0, 0)),   # batch_embedding tile
            pl.BlockSpec((tb, L, L),  lambda b: (b, 0, 0)),   # adjacency tile
            pl.BlockSpec((tb, L, 1),  lambda b: (b, 0, 0)),   # aspect mask tile
            pl.BlockSpec((tb, 1),     lambda b: (b, 0)),      # aspect lengths
            pl.BlockSpec((tb, 1),     lambda b: (b, 0)),      # labels
            pl.BlockSpec((D2, H),     lambda b: (0, 0)),      # W1 (grid-resident)
            pl.BlockSpec((1, H),      lambda b: (0, 0)),      # b1
            pl.BlockSpec((H, H),      lambda b: (0, 0)),      # W2
            pl.BlockSpec((1, H),      lambda b: (0, 0)),      # b2
            pl.BlockSpec((H, PADW),   lambda b: (0, 0)),      # Wp (lane-padded)
            pl.BlockSpec((1, PADW),   lambda b: (0, 0)),      # bp (lane-padded)
        ],
        out_specs=pl.BlockSpec((tb, PADW), lambda b: (b, 0)),
    )

    out = pl.pallas_call(
        cdt_kernel,
        out_shape=jax.ShapeDtypeStruct((B, PADW), jnp.float32),
        grid_spec=grid_spec,
        compiler_params=pltpu.CompilerParams(
            dimension_semantics=("parallel",)),   # batch axis: shards over v7x's 2 TCs
        cost_estimate=cost,
    )(batch_embedding, adj, mask_col, alen, lbls, w1, b1, w2, b2, wp_pad, bp_pad)

    pred = out[:, :P]
    loss = jnp.mean(out[:, PADW - 1])             # nn.CrossEntropyLoss(reduction='mean')
    return pred, loss


# ---------------------------------------------------------------------------
# Pure-JAX reference for verification
# ---------------------------------------------------------------------------
def reference(x, adj, mask, aspect_len, labels, w1, b1, w2, b2, wp, bp):
    denom = jnp.sum(adj, axis=2, keepdims=True) + 1.0
    h = jnp.einsum('bld,dh->blh', x, w1)
    h = jnp.maximum(jnp.einsum('bij,bjh->bih', adj, h) / denom + b1, 0.0)
    h = jnp.einsum('blh,hk->blk', h, w2)
    h = jnp.maximum(jnp.einsum('bij,bjh->bih', adj, h) / denom + b2, 0.0)
    gsum = jnp.sum(h * mask[:, :, None], axis=1)
    gave = gsum / aspect_len[:, None]
    pred = gave @ wp + bp[0]
    logz = jax.nn.logsumexp(pred, axis=-1)
    nll = logz - pred[jnp.arange(pred.shape[0]), labels]
    return pred, jnp.mean(nll)


if __name__ == "__main__":
    B, L, H, P = 16, 8, 32, 3          # batch, max_len, hidden_size_bert, polarity_num
    D2 = 2 * H
    TB = 8                             # examples per grid step (2 grid steps total)

    key = jax.random.PRNGKey(0)
    keys = jax.random.split(key, 10)

    # deterministic "parameters" (GraphConvolution 2H->H, H->H; Linear H->P)
    w1 = 0.1 * jax.random.normal(keys[0], (D2, H), jnp.float32)
    b1 = 0.1 * jax.random.normal(keys[1], (1, H), jnp.float32)
    w2 = 0.1 * jax.random.normal(keys[2], (H, H), jnp.float32)
    b2 = 0.1 * jax.random.normal(keys[3], (1, H), jnp.float32)
    wp = 0.1 * jax.random.normal(keys[4], (H, P), jnp.float32)
    bp = 0.1 * jax.random.normal(keys[5], (1, P), jnp.float32)

    # deterministic inputs
    batch_embedding = jax.random.normal(keys[6], (B, L, D2), jnp.float32)
    adj = (jax.random.uniform(keys[7], (B, L, L)) > 0.6).astype(jnp.float32)
    adj = jnp.maximum(adj, jnp.transpose(adj, (0, 2, 1)))        # symmetric 0/1 adjacency
    extract_mask = (jax.random.uniform(keys[8], (B, L)) > 0.5).astype(jnp.float32)
    extract_mask = extract_mask.at[:, 0].set(1.0)                # at least one aspect token
    aspect_len = jnp.sum(extract_mask, axis=1).astype(jnp.float32)        # (B,)
    labels = jax.random.randint(keys[9], (B,), 0, P, jnp.int32)

    pred, loss = cdt_bert_extract_term(batch_embedding, adj, extract_mask,
                                       aspect_len, labels,
                                       w1, b1, w2, b2, wp, bp, tb=TB)
    jax.block_until_ready((pred, loss))

    pred_ref, loss_ref = reference(batch_embedding, adj, extract_mask,
                                   aspect_len, labels, w1, b1, w2, b2, wp, bp)
    assert jnp.allclose(pred, pred_ref, rtol=1e-4, atol=1e-4), "pred mismatch"
    assert jnp.allclose(loss, loss_ref, rtol=1e-4, atol=1e-4), "loss mismatch"

    print("KERNEL_OK")
</pallas_src>

<mosaic_0001>
module attributes {stable_mosaic.version = 11 : i64} {
  func.func @cdt_kernel(%arg0: i32, %arg1: memref<8x8x64xf32, #tpu.memory_space<vmem>>, %arg2: memref<8x8x8xf32, #tpu.memory_space<vmem>>, %arg3: memref<8x8x1xf32, #tpu.memory_space<vmem>>, %arg4: memref<8x1xf32, #tpu.memory_space<vmem>>, %arg5: memref<8x1xi32, #tpu.memory_space<vmem>>, %arg6: memref<64x32xf32, #tpu.memory_space<vmem>>, %arg7: memref<1x32xf32, #tpu.memory_space<vmem>>, %arg8: memref<32x32xf32, #tpu.memory_space<vmem>>, %arg9: memref<1x32xf32, #tpu.memory_space<vmem>>, %arg10: memref<32x128xf32, #tpu.memory_space<vmem>>, %arg11: memref<1x128xf32, #tpu.memory_space<vmem>>, %arg12: memref<8x128xf32, #tpu.memory_space<vmem>>) attributes {dimension_semantics = [#tpu.dimension_semantics<parallel>], iteration_bounds = array<i64: 2>, scalar_prefetch = 0 : i64, scratch_operands = 0 : i64, tpu.core_type = #tpu.core_type<tc>, window_params = [{transform_indices = @transform_0, window_bounds = array<i64: 8, 8, 64>}, {transform_indices = @transform_1, window_bounds = array<i64: 8, 8, 8>}, {transform_indices = @transform_2, window_bounds = array<i64: 8, 8, 1>}, {transform_indices = @transform_3, window_bounds = array<i64: 8, 1>}, {transform_indices = @transform_4, window_bounds = array<i64: 8, 1>}, {pipeline_mode = #tpu.pipeline_mode<synchronous>, transform_indices = @transform_5, window_bounds = array<i64: 64, 32>}, {pipeline_mode = #tpu.pipeline_mode<synchronous>, transform_indices = @transform_6, window_bounds = array<i64: 1, 32>}, {pipeline_mode = #tpu.pipeline_mode<synchronous>, transform_indices = @transform_7, window_bounds = array<i64: 32, 32>}, {pipeline_mode = #tpu.pipeline_mode<synchronous>, transform_indices = @transform_8, window_bounds = array<i64: 1, 32>}, {pipeline_mode = #tpu.pipeline_mode<synchronous>, transform_indices = @transform_9, window_bounds = array<i64: 32, 128>}, {pipeline_mode = #tpu.pipeline_mode<synchronous>, transform_indices = @transform_10, window_bounds = array<i64: 1, 128>}, {transform_indices = @transform_11, window_bounds = array<i64: 8, 128>}]} {
    %c0 = arith.constant 0 : index
    %c0_0 = arith.constant 0 : index
    %c0_1 = arith.constant 0 : index
    %0 = vector.load %arg2[%c0, %c0_0, %c0_1] : memref<8x8x8xf32, #tpu.memory_space<vmem>>, vector<8x8x8xf32>
    %cst = arith.constant dense<0.000000e+00> : vector<8x8xf32>
    %1 = vector.multi_reduction <add>, %0, %cst [2] : vector<8x8x8xf32> to vector<8x8xf32>
    %2 = vector.shape_cast %1 : vector<8x8xf32> to vector<8x8x1xf32>
    %cst_2 = arith.constant 1.000000e+00 : f32
    %3 = vector.broadcast %cst_2 : f32 to vector<8x8x1xf32>
    %4 = arith.addf %2, %3 : vector<8x8x1xf32>
    %5 = tpu.reciprocal %4 : vector<8x8x1xf32> -> vector<8x8x1xf32>
    %6 = vector.broadcast %5 : vector<8x8x1xf32> to vector<8x8x8xf32>
    %7 = arith.mulf %0, %6 : vector<8x8x8xf32>
    %c0_3 = arith.constant 0 : index
    %c0_4 = arith.constant 0 : index
    %c0_5 = arith.constant 0 : index
    %8 = vector.load %arg1[%c0_3, %c0_4, %c0_5] : memref<8x8x64xf32, #tpu.memory_space<vmem>>, vector<8x8x64xf32>
    %9 = vector.shape_cast %8 : vector<8x8x64xf32> to vector<64x64xf32>
    %c0_6 = arith.constant 0 : index
    %c0_7 = arith.constant 0 : index
    %10 = vector.load %arg6[%c0_6, %c0_7] : memref<64x32xf32, #tpu.memory_space<vmem>>, vector<64x32xf32>
    %cst_8 = arith.constant dense<0.000000e+00> : vector<64x32xf32>
    %11 = tpu.matmul %9, %10, %cst_8 {dimension_numbers = #tpu.dot_dimension_numbers<[1], [0], [0], [1], [0, 0, 1, 1], [], []>} : vector<64x64xf32>, vector<64x32xf32>, vector<64x32xf32> -> vector<64x32xf32>
    %12 = vector.shape_cast %11 : vector<64x32xf32> to vector<8x8x32xf32>
    "tpu.trace_start"() <{level = 10 : i32, message = "bij,bjh->bih"}> : () -> ()
    %cst_9 = arith.constant dense<0.000000e+00> : vector<8x8x32xf32>
    %13 = tpu.matmul %7, %12, %cst_9 {dimension_numbers = #tpu.dot_dimension_numbers<[2], [1], [1], [2], [0, 0, 0, 1, 1, 2], [0], [0]>} : vector<8x8x8xf32>, vector<8x8x32xf32>, vector<8x8x32xf32> -> vector<8x8x32xf32>
    "tpu.trace_stop"() : () -> ()
    %c0_10 = arith.constant 0 : index
    %c0_11 = arith.constant 0 : index
    %14 = vector.load %arg7[%c0_10, %c0_11] : memref<1x32xf32, #tpu.memory_space<vmem>>, vector<1x32xf32>
    %15 = vector.shape_cast %14 : vector<1x32xf32> to vector<1x1x32xf32>
    %16 = vector.broadcast %15 : vector<1x1x32xf32> to vector<8x8x32xf32>
    %17 = arith.addf %13, %16 : vector<8x8x32xf32>
    %cst_12 = arith.constant 0.000000e+00 : f32
    %18 = vector.broadcast %cst_12 : f32 to vector<8x8x32xf32>
    %19 = arith.maximumf %17, %18 : vector<8x8x32xf32>
    %20 = vector.shape_cast %19 : vector<8x8x32xf32> to vector<64x32xf32>
    %c0_13 = arith.constant 0 : index
    %c0_14 = arith.constant 0 : index
    %21 = vector.load %arg8[%c0_13, %c0_14] : memref<32x32xf32, #tpu.memory_space<vmem>>, vector<32x32xf32>
    %cst_15 = arith.constant dense<0.000000e+00> : vector<64x32xf32>
    %22 = tpu.matmul %20, %21, %cst_15 {dimension_numbers = #tpu.dot_dimension_numbers<[1], [0], [0], [1], [0, 0, 1, 1], [], []>} : vector<64x32xf32>, vector<32x32xf32>, vector<64x32xf32> -> vector<64x32xf32>
    %23 = vector.shape_cast %22 : vector<64x32xf32> to vector<8x8x32xf32>
    "tpu.trace_start"() <{level = 10 : i32, message = "bij,bjh->bih"}> : () -> ()
    %cst_16 = arith.constant dense<0.000000e+00> : vector<8x8x32xf32>
    %24 = tpu.matmul %7, %23, %cst_16 {dimension_numbers = #tpu.dot_dimension_numbers<[2], [1], [1], [2], [0, 0, 0, 1, 1, 2], [0], [0]>} : vector<8x8x8xf32>, vector<8x8x32xf32>, vector<8x8x32xf32> -> vector<8x8x32xf32>
    "tpu.trace_stop"() : () -> ()
    %c0_17 = arith.constant 0 : index
    %c0_18 = arith.constant 0 : index
    %25 = vector.load %arg9[%c0_17, %c0_18] : memref<1x32xf32, #tpu.memory_space<vmem>>, vector<1x32xf32>
    %26 = vector.shape_cast %25 : vector<1x32xf32> to vector<1x1x32xf32>
    %27 = vector.broadcast %26 : vector<1x1x32xf32> to vector<8x8x32xf32>
    %28 = arith.addf %24, %27 : vector<8x8x32xf32>
    %cst_19 = arith.constant 0.000000e+00 : f32
    %29 = vector.broadcast %cst_19 : f32 to vector<8x8x32xf32>
    %30 = arith.maximumf %28, %29 : vector<8x8x32xf32>
    %c0_20 = arith.constant 0 : index
    %c0_21 = arith.constant 0 : index
    %c0_22 = arith.constant 0 : index
    %31 = vector.load %arg3[%c0_20, %c0_21, %c0_22] : memref<8x8x1xf32, #tpu.memory_space<vmem>>, vector<8x8x1xf32>
    %32 = vector.broadcast %31 : vector<8x8x1xf32> to vector<8x8x32xf32>
    %33 = arith.mulf %30, %32 : vector<8x8x32xf32>
    %cst_23 = arith.constant dense<0.000000e+00> : vector<8x32xf32>
    %34 = vector.multi_reduction <add>, %33, %cst_23 [1] : vector<8x8x32xf32> to vector<8x32xf32>
    %c0_24 = arith.constant 0 : index
    %c0_25 = arith.constant 0 : index
    %35 = vector.load %arg4[%c0_24, %c0_25] : memref<8x1xf32, #tpu.memory_space<vmem>>, vector<8x1xf32>
    %36 = tpu.reciprocal %35 : vector<8x1xf32> -> vector<8x1xf32>
    %37 = vector.broadcast %36 : vector<8x1xf32> to vector<8x32xf32>
    %38 = arith.mulf %34, %37 : vector<8x32xf32>
    %c0_26 = arith.constant 0 : index
    %c0_27 = arith.constant 0 : index
    %39 = vector.load %arg10[%c0_26, %c0_27] : memref<32x128xf32, #tpu.memory_space<vmem>>, vector<32x128xf32>
    %cst_28 = arith.constant dense<0.000000e+00> : vector<8x128xf32>
    %40 = tpu.matmul %38, %39, %cst_28 {dimension_numbers = #tpu.dot_dimension_numbers<[1], [0], [0], [1], [0, 0, 1, 1], [], []>} : vector<8x32xf32>, vector<32x128xf32>, vector<8x128xf32> -> vector<8x128xf32>
    %c0_29 = arith.constant 0 : index
    %c0_30 = arith.constant 0 : index
    %41 = vector.load %arg11[%c0_29, %c0_30] : memref<1x128xf32, #tpu.memory_space<vmem>>, vector<1x128xf32>
    %42 = vector.broadcast %41 : vector<1x128xf32> to vector<8x128xf32>
    %43 = arith.addf %40, %42 : vector<8x128xf32>
    %cst_31 = arith.constant dense<0xFF800000> : vector<8xf32>
    %44 = vector.multi_reduction <maximumf>, %43, %cst_31 [1] : vector<8x128xf32> to vector<8xf32>
    %45 = vector.shape_cast %44 : vector<8xf32> to vector<8x1xf32>
    %46 = vector.broadcast %45 : vector<8x1xf32> to vector<8x128xf32>
    %47 = arith.subf %43, %46 : vector<8x128xf32>
    %48 = math.exp %47 : vector<8x128xf32>
    %cst_32 = arith.constant dense<0.000000e+00> : vector<8xf32>
    %49 = vector.multi_reduction <add>, %48, %cst_32 [1] : vector<8x128xf32> to vector<8xf32>
    %50 = vector.shape_cast %49 : vector<8xf32> to vector<8x1xf32>
    %51 = math.log %50 : vector<8x1xf32>
    %52 = arith.addf %45, %51 : vector<8x1xf32>
    %53 = tpu.iota {dimensions = array<i32: 1>} : vector<8x128xi32>
    %c0_33 = arith.constant 0 : index
    %c0_34 = arith.constant 0 : index
    %54 = vector.load %arg5[%c0_33, %c0_34] : memref<8x1xi32, #tpu.memory_space<vmem>>, vector<8x1xi32>
    %55 = vector.broadcast %54 : vector<8x1xi32> to vector<8x128xi32>
    %56 = arith.cmpi eq, %53, %55 : vector<8x128xi32>
    %cst_35 = arith.constant 0.000000e+00 : f32
    %57 = vector.broadcast %cst_35 : f32 to vector<8x128xf32>
    %58 = arith.select %56, %43, %57 : vector<8x128xi1>, vector<8x128xf32>
    %cst_36 = arith.constant dense<0.000000e+00> : vector<8xf32>
    %59 = vector.multi_reduction <add>, %58, %cst_36 [1] : vector<8x128xf32> to vector<8xf32>
    %60 = vector.shape_cast %59 : vector<8xf32> to vector<8x1xf32>
    %61 = arith.subf %52, %60 : vector<8x1xf32>
    %c127_i32 = arith.constant 127 : i32
    %62 = vector.broadcast %c127_i32 : i32 to vector<8x128xi32>
    %63 = arith.cmpi eq, %53, %62 : vector<8x128xi32>
    %64 = vector.shape_cast %61 : vector<8x1xf32> to vector<8x1xf32>
    %65 = vector.broadcast %64 : vector<8x1xf32> to vector<8x128xf32>
    %66 = arith.select %63, %65, %43 : vector<8x128xi1>, vector<8x128xf32>
    %c0_37 = arith.constant 0 : index
    %c0_38 = arith.constant 0 : index
    %67 = vector.load %arg12[%c0_37, %c0_38] : memref<8x128xf32, #tpu.memory_space<vmem>>, vector<8x128xf32>
    tpu.vector_store %arg12[%c0_37, %c0_38], %66 {strides = array<i32>} : memref<8x128xf32, #tpu.memory_space<vmem>>, vector<8x128xf32>,
    return
  }
  func.func @transform_0(%arg0: i32) -> (i32, i32, i32) {
    %c0_i32 = arith.constant 0 : i32
    %c0_i32_0 = arith.constant 0 : i32
    %c0_i32_1 = arith.constant 0 : i32
    return %arg0, %c0_i32, %c0_i32_0 : i32, i32, i32
  }
  func.func @transform_1(%arg0: i32) -> (i32, i32, i32) {
    %c0_i32 = arith.constant 0 : i32
    %c0_i32_0 = arith.constant 0 : i32
    %c0_i32_1 = arith.constant 0 : i32
    return %arg0, %c0_i32, %c0_i32_0 : i32, i32, i32
  }
  func.func @transform_2(%arg0: i32) -> (i32, i32, i32) {
    %c0_i32 = arith.constant 0 : i32
    %c0_i32_0 = arith.constant 0 : i32
    %c0_i32_1 = arith.constant 0 : i32
    return %arg0, %c0_i32, %c0_i32_0 : i32, i32, i32
  }
  func.func @transform_3(%arg0: i32) -> (i32, i32) {
    %c0_i32 = arith.constant 0 : i32
    %c0_i32_0 = arith.constant 0 : i32
    return %arg0, %c0_i32 : i32, i32
  }
  func.func @transform_4(%arg0: i32) -> (i32, i32) {
    %c0_i32 = arith.constant 0 : i32
    %c0_i32_0 = arith.constant 0 : i32
    return %arg0, %c0_i32 : i32, i32
  }
  func.func @transform_5(%arg0: i32) -> (i32, i32) {
    %c0_i32 = arith.constant 0 : i32
    %c0_i32_0 = arith.constant 0 : i32
    %c0_i32_1 = arith.constant 0 : i32
    return %c0_i32, %c0_i32_0 : i32, i32
  }
  func.func @transform_6(%arg0: i32) -> (i32, i32) {
    %c0_i32 = arith.constant 0 : i32
    %c0_i32_0 = arith.constant 0 : i32
    %c0_i32_1 = arith.constant 0 : i32
    return %c0_i32, %c0_i32_0 : i32, i32
  }
  func.func @transform_7(%arg0: i32) -> (i32, i32) {
    %c0_i32 = arith.constant 0 : i32
    %c0_i32_0 = arith.constant 0 : i32
    %c0_i32_1 = arith.constant 0 : i32
    return %c0_i32, %c0_i32_0 : i32, i32
  }
  func.func @transform_8(%arg0: i32) -> (i32, i32) {
    %c0_i32 = arith.constant 0 : i32
    %c0_i32_0 = arith.constant 0 : i32
    %c0_i32_1 = arith.constant 0 : i32
    return %c0_i32, %c0_i32_0 : i32, i32
  }
  func.func @transform_9(%arg0: i32) -> (i32, i32) {
    %c0_i32 = arith.constant 0 : i32
    %c0_i32_0 = arith.constant 0 : i32
    %c0_i32_1 = arith.constant 0 : i32
    return %c0_i32, %c0_i32_0 : i32, i32
  }
  func.func @transform_10(%arg0: i32) -> (i32, i32) {
    %c0_i32 = arith.constant 0 : i32
    %c0_i32_0 = arith.constant 0 : i32
    %c0_i32_1 = arith.constant 0 : i32
    return %c0_i32, %c0_i32_0 : i32, i32
  }
  func.func @transform_11(%arg0: i32) -> (i32, i32) {
    %c0_i32 = arith.constant 0 : i32
    %c0_i32_0 = arith.constant 0 : i32
    return %arg0, %c0_i32 : i32, i32
  }
}

</mosaic_0001>

<bundles_post_ra>
// kernel: tpu_custom_call.1
= control target key start
LH: loop header
LB: loop body
LE: loop exit
PB: predicated region body
PF: predicated region fallthrough
CT: control target
= control target key end

     0   :  { %16 = vsyncpa [#allocation3], 0  ;;  %s3178_s0 = inlined_call_operand.vmem [shape: f32[16,8,64], index: 0, kind: input, shape index: {}]   ;;  %s3179_s1 = inlined_call_operand.vmem [shape: f32[16,8,8], index: 1, kind: input, shape index: {}]   ;;  %s3180_s2 = inlined_call_operand.vmem [shape: f32[16,8,1], index: 2, kind: input, shape index: {}]   ;;  %s3181_s3 = inlined_call_operand.vmem [shape: f32[16,1], index: 3, kind: input, shape index: {}]   ;;  %s3182_s4 = inlined_call_operand.vmem [shape: s32[16,1], index: 4, kind: input, shape index: {}]   ;;  %s3183_s5 = inlined_call_operand.vmem [shape: f32[64,32], index: 5, kind: input, shape index: {}]   ;;  %s3184_s6 = inlined_call_operand.vmem [shape: f32[1,32], index: 6, kind: input, shape index: {}]   ;;  %s3185_s7 = inlined_call_operand.vmem [shape: f32[32,32], index: 7, kind: input, shape index: {}]   ;;  %s3186_s8 = inlined_call_operand.vmem [shape: f32[1,32], index: 8, kind: input, shape index: {}]   ;;  %s3187_s9 = inlined_call_operand.vmem [shape: f32[32,128], index: 9, kind: input, shape index: {}]   ;;  %s3188_s10 = inlined_call_operand.vmem [shape: f32[1,128], index: 10, kind: input, shape index: {}]   ;;  %s3189_s11 = inlined_call_operand.hbm [shape: f32[16,128], index: 11, kind: output, shape index: {}]  }
   0x1   :  { %18 = vsyncpa [#allocation3 + $0x1], 0  ;;  %s2823_s17 = smov 0   ;;  %s2825_s18 = smov 0  }
   0x2   :  { %s2827_s19 = smov 0   ;;  %s2829_s20 = smov 0  }
   0x3 LB: > { %s2844_s21 = sadd.s32 4294967295, %s2757_s20   ;;  %s2374_s22 = sadd.s32 4294967294, %s2757_s20   ;;  %s2757_s20 = sphi %s2829_s20, %s3197_s20   ;;  %s2753_s19 = sphi %s2827_s19, %s3196_s19   ;;  %s2749_s18 = sphi %s2825_s18, %s3195_s18   ;;  %s2745_s17 = sphi %s2823_s17, %s3194_s17  }
   0x4   : > { %s2848_s23 = sadd.s32 1, %s2757_s20   ;;  %s287_s24 = sadd.s32 1, %s2753_s19 }
   0x5   : > { %s284_s25 = ssub.s32 %s2757_s20, %s2848_s23  ;;  %p297_p0 = scmp.ne.s32.totalorder %s2753_s19, %s2749_s18 }
   0x6   : > { %p285_p1 = scmp.eq.s32.totalorder %s284_s25, 0  ;;  %p298_p2 = scmp.eq.s32.totalorder %s2844_s21, 1 }
   0x7   : > { %p303_p3 = scmp.ne.s32.totalorder %s2749_s18, %s2745_s17  ;;  %p304_p4 = scmp.eq.s32.totalorder %s2374_s22, 1 }
   0x8   : > { %s2859_s26 = scalar_select %p285_p1, %s2753_s19, %s287_s24  }
   0x9   : > { %p2861_p5 = por %p298_p2, %p297_p0  ;;  %p2865_p6 = por %p304_p4, %p303_p3 }
   0xa   : > { %3190 = sst [smem:[#allocation5_spill]] %s2859_s26  ;;  %p2377_p7 = scmp.ge.s32.totalorder %s2757_s20, 1 }
   0xb   : > { %p381_p8 = scmp.lt.s32.totalorder %s2757_s20, 3 }
   0xd   : > { %p382_p9 = pnand %p2377_p7, %p381_p8 }
   0xe   : > { %s2379_s14 = sshll.u32 (!%p382_p9), %s2844_s21, 3  ;;  %p457_p11 = scmp.lt.s32.totalorder (!%p382_p9), %s2844_s21, 1 }
   0xf   : > { %385 = sbr.rel (%p382_p9) target bundleno = 1395 (0x573), region = 64  ;;  %p440_p10 = scmp.lt.s32.totalorder (!%p382_p9), %s2379_s14, 15 }
  0x14   : > { %v537_v0 = vld [vmem:[%s3183_s5 + $0x38] sm:$0xff]  ;;  %v536_v1 = vld [vmem:[%s3183_s5 + $0x30] sm:$0xff]  ;;  %v535_v2 = vld [vmem:[%s3183_s5 + $0x28] sm:$0xff]  ;;  %s3199_s14 = smov (!%p440_p10, %s2379_s14), 15  ;;  %vm538_vm0 = vcmask 523264   ;;  %vm473_vm1 = vcmask 64512  }
  0x15   : > { %2492 = vmatprep.subr.mxu0 %v537_v0  ;;  %v534_v3 = vld [vmem:[%s3183_s5 + $0x20] sm:$0xff]  ;;  %s2884_s25 = sshll.u32 %s3199_s14, 3  ;;  %v533_v4 = vld [vmem:[%s3183_s5 + $0x18] sm:$0xff]  ;;  %v532_v6 = vld [vmem:[%s3183_s5 + $0x10] sm:$0xff]  ;;  %v2759_v32 = vmov 0.0   ;;  %vm2760_vm2 = vmmov 0  }
  0x16   : > { %2493 = vmatpush3.msra.mxu0 %v537_v0  ;;  %s2893_s15 = scalar_lea.vmem %s3178_s0, %s2884_s25  ;;  %s2899_s22 = scalar_lea.vmem %s3179_s1, %s2884_s25  ;;  %v531_v7 = vld [vmem:[%s3183_s5 + $0x8] sm:$0xff]  ;;  %v530_v14 = vld [vmem:[%s3183_s5] sm:$0xff]  ;;  %2520 = vmatprep.subr.mxu1 %v2759_v32  ;;  %vm1271_vm3 = vcmask 261120   ;;  %vm2137_vm4 = vcmask 1041409   ;;  %vm2140_vm5 = vcmask 1042434   ;;  %vm2143_vm6 = vcmask 1043459  }
  0x17   : > { %2494 = vmatprep.subr.mxu0 %v536_v1  ;;  %v522_v5 = vld [vmem:[%s2893_s15] sm:$0xff]  ;;  %v2915_v10 = vld [vmem:[%s2899_s22 + $0x8] sm:$0xff]  ;;  %v2918_v11 = vld [vmem:[%s2899_s22 + $0x10] sm:$0xff]  ;;  %2522 = vmatprep.mubr.msk.f32.mxu1 %vm2760_vm2, %v2759_v32  ;;  %s455_s16 = scalar_lea.vmem %s3180_s2, %s2884_s25  ;;  %vm2146_vm7 = vcmask 1044484   ;;  %vm2149_vm8 = vcmask 1045509   ;;  %vm2152_vm9 = vcmask 1046534  }
  0x18   : > { %2495 = vmatpush3.msra.mxu0 %v536_v1  ;;  %2508 = vmatprep.mubr.msk.f32.mxu0 %vm538_vm0, %v522_v5  ;;  %v2910_v8 = vld [vmem:[%s2899_s22] sm:$0xff]  ;;  %v2921_v12 = vld [vmem:[%s2899_s22 + $0x18] sm:$0xff]  ;;  %v480_v13 = vsel %vm473_vm1, %v2918_v11, 0.0  ;;  %v477_v15 = vsel %vm473_vm1, %v2915_v10, 0.0  ;;  %v523_v18 = vld [vmem:[%s2893_s15 + $0x8] sm:$0xff]  ;;  %vm2155_vm10 = vcmask 1047559  }
  0x19   : > { %2496 = vmatprep.subr.mxu0 %v535_v2  ;;  %v474_v9 = vsel %vm473_vm1, %v2910_v8, 0.0  ;;  %481 = vadd.xlane.f32.xlu1 %v480_v13  ;;  %v483_v16 = vsel %vm473_vm1, %v2921_v12, 0.0  ;;  %v2933_v17 = vld [vmem:[%s2899_s22 + $0x20] sm:$0xff]  ;;  %v2937_v19 = vld [vmem:[%s2899_s22 + $0x28] sm:$0xff]  ;;  %v524_v20 = vld [vmem:[%s2893_s15 + $0x10] sm:$0xff] }
  0x1a   : > { %2497 = vmatpush3.msra.mxu0 %v535_v2  ;;  %475 = vadd.xlane.f32.xlu0 %v474_v9  ;;  %v486_v21 = vsel %vm473_vm1, %v2933_v17, 0.0  ;;  %v489_v22 = vsel %vm473_vm1, %v2937_v19, 0.0  ;;  %v2946_v23 = vld [vmem:[%s2899_s22 + $0x30] sm:$0xff]  ;;  %v525_v24 = vld [vmem:[%s2893_s15 + $0x18] sm:$0xff]  ;;  %v526_v26 = vld [vmem:[%s2893_s15 + $0x20] sm:$0xff] }
  0x1b   : > { %2498 = vmatprep.subr.mxu0 %v534_v3  ;;  %v2951_v25 = vld [vmem:[%s2899_s22 + $0x38] sm:$0xff]  ;;  %v492_v27 = vsel %vm473_vm1, %v2946_v23, 0.0  ;;  %v527_v29 = vld [vmem:[%s2893_s15 + $0x28] sm:$0xff]  ;;  %v528_v30 = vld [vmem:[%s2893_s15 + $0x30] sm:$0xff]  ;;  %s458_s22 = scalar_select %p457_p11, %s2844_s21, 1 }
  0x1c   : > { %2499 = vmatpush3.msra.mxu0 %v534_v3  ;;  %v495_v28 = vsel %vm473_vm1, %v2951_v25, 0.0  ;;  %v529_v31 = vld [vmem:[%s2893_s15 + $0x38] sm:$0xff]  ;;  %v2395_v13 = vld [vmem:[%s3184_s6] ss:$0 sm:$0xff]  ;;  %s436_s15 = sand.u32 1, %s2749_s18  }
  0x1d   : > { %2500 = vmatprep.subr.mxu0 %v533_v4  ;;  %484 = vadd.xlane.f32.xlu1 %v483_v16  ;;  %v1270_v9 = vld [vmem:[%s3185_s7 + $0x18] sm:$0xff]  ;;  %s2385_s14 = sshll.u32 %s458_s22, 3  ;;  %s2424_s22 = sshll.u32 %s2844_s21, 7 }
  0x1e   : > { %2501 = vmatpush3.msra.mxu0 %v533_v4  ;;  %478 = vadd.xlane.f32.xlu0 %v477_v15  ;;  %s460_s26 = scalar_lea.vmem %s3181_s3, %s2385_s14  ;;  %s464_s12 = scalar_lea.vmem %s3182_s4, %s2385_s14 }
  0x1f   : > { %2502 = vmatprep.subr.mxu0 %v532_v6  ;;  %s3143_s25 = scalar_lea.hbm %s3189_s11, %s2424_s22  ;;  %s2254_s30 = scalar_lea.sflag [#allocation3], %s436_s15 }
  0x20   : > { %2503 = vmatpush3.msra.mxu0 %v532_v6  ;;  %s2762_s21 = smov [#allocation2]  }
  0x21   : > { %2504 = vmatprep.subr.mxu0 %v531_v7  ;;  %490 = vadd.xlane.f32.xlu1 %v489_v22  ;;  %s2701_s13 = sshll.u32 %s2762_s21, 4  ;;  %s2702_s13 = int_to_ptr.vmem [resolvable:$false] %s2701_s13 }
  0x22   : > { %2505 = vmatpush3.msra.mxu0 %v531_v7  ;;  %487 = vadd.xlane.f32.xlu0 %v486_v21 }
  0x23   : > { %2506 = vmatprep.subr.mxu0 %v530_v14 }
  0x24   : > { %2507 = vmatpush3.msra.mxu0 %v530_v14 }
  0x25   : > { %2509 = vmatmul.mubr.msk.f32.vlgmr.msra.gmra.mxu0 %vm538_vm0, %v523_v18  ;;  %496 = vadd.xlane.f32.xlu1 %v495_v28 }
  0x26   : > { %2511 = vmatprep.mubr.msk.f32.mxu0 %vm538_vm0, %v524_v20  ;;  %493 = vadd.xlane.f32.xlu0 %v492_v27 }
  0x27   : > { %2560 = vmatprep.subr.mxu0 %v1270_v9 }
  0x28   : > { %2561 = vmatpush3.msra.mxu0 %v1270_v9  ;;  %v2412_v9 = vld [vmem:[%s3186_s8] ss:$0 sm:$0xff] }
  0x29   : > { %2512 = vmatmul.mubr.msk.f32.gmra.mxu0 %vm538_vm0, %v525_v24 }
  0x2a   : > { %2514 = vmatprep.mubr.msk.f32.mxu0 %vm538_vm0, %v526_v26 }
  0x2d   : > { %2515 = vmatmul.mubr.msk.f32.gmra.mxu0 %vm538_vm0, %v527_v29 }
  0x2e   : > { %2517 = vmatprep.mubr.msk.f32.mxu0 %vm538_vm0, %v528_v30 }
  0x31   : > { %2518 = vmatmul.mubr.msk.f32.gmra.mxu0 %vm538_vm0, %v529_v31 }
  0xa2   : > { %v482_v36 = vpop.xlane.xlu1 %481 }
  0xa3   : > { %v476_v33 = vpop.xlane.xlu0 %475  ;;  %v500_v38 = vadd.f32 1.0, %v482_v36 }
  0xa4   : > { %v498_v34 = vadd.f32 1.0, %v476_v33 }
  0xa6   : > { %2675 = vrcp.f32 %v498_v34  ;;  %v485_v39 = vpop.xlane.xlu1 %484 }
  0xa7   : > { %v479_v35 = vpop.xlane.xlu0 %478  ;;  %v501_v40 = vadd.f32 1.0, %v485_v39 }
  0xa8   : > { %v499_v37 = vadd.f32 1.0, %v479_v35 }
  0xaa   : > { %2677 = vrcp.f32 %v499_v37  ;;  %v491_v44 = vpop.xlane.xlu1 %490 }
  0xab   : > { %2679 = vrcp.f32 %v500_v38  ;;  %v488_v41 = vpop.xlane.xlu0 %487  ;;  %v503_v47 = vadd.f32 1.0, %v491_v44 }
  0xac   : > { %2681 = vrcp.f32 %v501_v40  ;;  %v502_v42 = vadd.f32 1.0, %v488_v41 }
  0xae   : > { %2683 = vrcp.f32 %v502_v42  ;;  %v497_v55 = vpop.xlane.xlu1 %496 }
  0xaf   : > { %v494_v49 = vpop.xlane.xlu0 %493  ;;  %2685 = vrcp.f32 %v503_v47  ;;  %v505_v58 = vadd.f32 1.0, %v497_v55  ;;  %v2088_v55 = vld [vmem:[%s460_s26] sm:$0xff] }
  0xb0   : > { %v504_v53 = vadd.f32 1.0, %v494_v49  ;;  %v1978_v49 = vld [vmem:[%s455_s16 + $0x10] sm:$0xff] }
  0xb2   : > { %2687 = vrcp.f32 %v504_v53  ;;  %v1979_v53 = vld [vmem:[%s455_s16 + $0x18] sm:$0xff] }
  0xb3   : > { %v2676_v43 = vpop.eup %2675  ;;  %2689 = vrcp.f32 %v505_v58  ;;  %v1982_v58 = vld [vmem:[%s455_s16 + $0x30] sm:$0xff] }
  0xb4   : > { %v2970_v46 = vmul.f32 %v2676_v43, %v2910_v8  ;;  %2691 = vrcp.f32 %v2088_v55 }
  0xb7   : > { %v2678_v48 = vpop.eup %2677 }
  0xb8   : > { %v2976_v52 = vmul.f32 %v2678_v48, %v2915_v10  ;;  %v2680_v54 = vpop.eup %2679  ;;  %v1269_v10 = vld [vmem:[%s3185_s7 + $0x10] sm:$0xff]  ;;  %v2761_v48 = vmov 0  }
  0xb9   : > { %v2984_v57 = vmul.f32 %v2680_v54, %v2918_v11  ;;  %v2682_v59 = vpop.eup %2681  ;;  %2562 = vmatprep.subr.mxu0 %v1269_v10  ;;  %v1268_v11 = vld [vmem:[%s3185_s7 + $0x8] sm:$0xff]  ;;  %2674 = vset.pattern.permute.xlu1 %v2761_v48  ;;  %v1980_v54 = vld [vmem:[%s455_s16 + $0x20] sm:$0xff] }
  0xba   : > { %v2992_v61 = vmul.f32 %v2682_v59, %v2921_v12  ;;  %2563 = vmatpush3.msra.mxu0 %v1269_v10  ;;  %v1267_v12 = vld [vmem:[%s3185_s7] sm:$0xff]  ;;  %2673 = vset.pattern.permute.xlu0 %v2761_v48  ;;  %v1983_v59 = vld [vmem:[%s455_s16 + $0x38] sm:$0xff] }
  0xbb   : > { %v2684_v62 = vpop.eup %2683  ;;  %2564 = vmatprep.subr.mxu0 %v1268_v11  ;;  %1996 = vperm.xlu1 %2674, %v1978_v49  }
  0xbc   : > { %v3000_v0 = vmul.f32 %v2684_v62, %v2933_v17  ;;  %v2686_v1 = vpop.eup %2685  ;;  %2565 = vmatpush3.msra.mxu0 %v1268_v11  ;;  %v2241_v62 = vld [vmem:[%s464_s12] sm:$0xff] }
  0xbd   : > { %v3008_v3 = vmul.f32 %v2686_v1, %v2937_v19  ;;  %2566 = vmatprep.subr.mxu0 %v1267_v12 }
  0xbe   : > { %2567 = vmatpush3.msra.mxu0 %v1267_v12 }
  0xbf   : > { %v2688_v4 = vpop.eup %2687  ;;  %2610 = vmatprep.subr.mxu0 %v2759_v32 }
  0xc0   : > { %v3016_v6 = vmul.f32 %v2688_v4, %v2946_v23  ;;  %v2690_v7 = vpop.eup %2689 }
  0xc1   : > { %v3024_v8 = vmul.f32 %v2690_v7, %v2951_v25 }
  0xe5   : > { %v2510_v45 = vpop.f32.mrf.mxu0 }
  0xe7   : > { %v629_v50 = vpop.f32.mrf.mxu0 }
  0xe8   : > { %2521 = vmatpush3.msra.mxu1 %v629_v50  ;;  %v1976_v50 = vld [vmem:[%s455_s16] sm:$0xff] }
  0xe9   : > { %2523 = vmatmul.mubr.msk.f32.vlgmr.msra.gmra.mxu1 %vm473_vm1, %v2970_v46  ;;  %2525 = vmatprep.subr.mxu1 %v2759_v32  ;;  %v2513_v51 = vpop.f32.mrf.mxu0 }
  0xea   : > { %2526 = vmatpush3.msra.mxu1 %v2510_v45  ;;  %2527 = vmatprep.mubr.msk.f32.mxu1 %vm2760_vm2, %v2759_v32 }
  0xeb   : > { %v639_v56 = vpop.f32.mrf.mxu0  ;;  %2530 = vmatprep.subr.mxu1 %v2759_v32  ;;  %1986 = vperm.xlu1 %2674, %v1976_v50  }
  0xed   : > { %2528 = vmatmul.mubr.msk.f32.vlgmr.msra.gmra.mxu1 %vm473_vm1, %v2976_v52  ;;  %v2516_v60 = vpop.f32.mrf.mxu0 }
  0xee   : > { %2531 = vmatpush3.msra.mxu1 %v639_v56  ;;  %2532 = vmatprep.mubr.msk.f32.mxu1 %vm2760_vm2, %v2759_v32  ;;  %v1981_v56 = vld [vmem:[%s455_s16 + $0x28] sm:$0xff] }
  0xef   : > { %2535 = vmatprep.subr.mxu1 %v2759_v32  ;;  %v649_v63 = vpop.f32.mrf.mxu0  ;;  %2001 = vperm.xlu1 %2674, %v1979_v53  }
  0xf1   : > { %2533 = vmatmul.mubr.msk.f32.vlgmr.msra.gmra.mxu1 %vm473_vm1, %v2984_v57  ;;  %v2519_v2 = vpop.f32.mrf.mxu0 }
  0xf2   : > { %2536 = vmatpush3.msra.mxu1 %v2513_v51  ;;  %2537 = vmatprep.mubr.msk.f32.mxu1 %vm2760_vm2, %v2759_v32  ;;  %v1977_v51 = vld [vmem:[%s455_s16 + $0x8] sm:$0xff]  ;;  %s2378_s16 = sshll.u32 %s436_s15, 3 }
  0xf3   : > { %2540 = vmatprep.subr.mxu1 %v2759_v32  ;;  %v659_v5 = vpop.f32.mrf.mxu0  ;;  %1991 = vperm.xlu0 %2673, %v1977_v51   ;;  %s438_s14 = scalar_lea.vmem [#allocation2], %s2378_s16  ;;  %s2703_s16 = scalar_lea.vmem %s2702_s13, 256 }
  0xf4   : > { %2006 = vperm.xlu1 %2674, %v1980_v54   ;;  %s2267_s24 = sshll.u32 %s438_s14, 4  ;;  %s2268_s24 = int_to_ptr.vmem [resolvable:$true] %s2267_s24 }
  0xf5   : > { %2538 = vmatmul.mubr.msk.f32.vlgmr.msra.gmra.mxu1 %vm473_vm1, %v2992_v61  ;;  %s2697_s12 = scalar_lea.vmem %s2268_s24, 128  ;;  %p2704_p1 = scmp.lt.s32.totalorder %s2268_s24, %s2702_s13 }
  0xf6   : > { %2541 = vmatpush3.msra.mxu1 %v649_v63  ;;  %2542 = vmatprep.mubr.msk.f32.mxu1 %vm2760_vm2, %v2759_v32  ;;  %p2698_p12 = scmp.ne.s32.totalorder %s2268_s24, %s2697_s12  ;;  %p2705_p2 = scmp.lt.s32.totalorder %s2703_s16, %s2697_s12 }
  0xf7   : > { %2545 = vmatprep.subr.mxu1 %v2759_v32 }
  0xf8   : > { %2011 = vperm.xlu1 %2674, %v1981_v56   ;;  %p2699_p13 = pnand %p2698_p12, %p2861_p5  ;;  %p2706_p3 = por %p2705_p2, %p2704_p1 }
  0xf9   : > { %2543 = vmatmul.mubr.msk.f32.vlgmr.msra.gmra.mxu1 %vm473_vm1, %v3000_v0 }
  0xfa   : > { %2546 = vmatpush3.msra.mxu1 %v2516_v60  ;;  %2547 = vmatprep.mubr.msk.f32.mxu1 %vm2760_vm2, %v2759_v32  ;;  %v2692_v60 = vpop.eup %2691  ;;  %p2700_p0 = pneg %p2699_p13 }
  0xfb   : > { %2550 = vmatprep.subr.mxu1 %v2759_v32 }
  0xfc   : > { %2016 = vperm.xlu1 %2674, %v1982_v58   ;;  %p2707_p4 = pnand %p2706_p3, %p2700_p0 }
  0xfd   : > { %2548 = vmatmul.mubr.msk.f32.vlgmr.msra.gmra.mxu1 %vm473_vm1, %v3008_v3 }
  0xfe   : > { %2551 = vmatpush3.msra.mxu1 %v659_v5  ;;  %2552 = vmatprep.mubr.msk.f32.mxu1 %vm2760_vm2, %v2759_v32  ;;  %v2118_v5 = vld [vmem:[%s3187_s9 + $0x8] sm:$0xff] }
  0xff   : > { %2555 = vmatprep.subr.mxu1 %v2759_v32 }
 0x100   : > { %2021 = vperm.xlu1 %2674, %v1983_v59  }
 0x101   : > { %2553 = vmatmul.mubr.msk.f32.vlgmr.msra.gmra.mxu1 %vm473_vm1, %v3016_v6 }
 0x102   : > { %2556 = vmatpush3.msra.mxu1 %v2519_v2  ;;  %2557 = vmatprep.mubr.msk.f32.mxu1 %vm2760_vm2, %v2759_v32 }
 0x103   : > { %2580 = vmatprep.subr.mxu1 %v2759_v32 }
 0x104   : > { %2092 = vperm.xlu1 %2674, %v2692_v60  }
 0x105   : > { %2558 = vmatmul.mubr.msk.f32.vlgmr.msra.gmra.mxu1 %vm473_vm1, %v3024_v8 }
 0x106   : > { %2582 = vmatprep.mubr.msk.f32.mxu1 %vm2760_vm2, %v2759_v32 }
 0x108   : > { %2243 = vperm.xlu1 %2674, %v2241_v62  }
 0x136   : > { %v1997_v7 = vpop.permute.xlu1 %1996 }
 0x1a9   : > { %v744_v14 = vpop.f32.mrf.mxu1 }
 0x1aa   : > { %v745_v15 = vadd.f32 %v2395_v13, %v744_v14 }
 0x1ab   : > { %v2524_v16 = vpop.f32.mrf.mxu1 }
 0x1ac   : > { %v1259_v17 = vmax.f32 %v745_v15, 0.0 }
 0x1ad   : > { %v817_v18 = vpop.f32.mrf.mxu1 }
 0x1ae   : > { %v818_v19 = vadd.f32 %v2395_v13, %v817_v18  ;;  %2568 = vmatprep.mubr.msk.f32.mxu0 %vm1271_vm3, %v1259_v17  ;;  %v1992_v18 = vpop.permute.xlu0 %1991 }
 0x1af   : > { %v2529_v20 = vpop.f32.mrf.mxu1 }
 0x1b0   : > { %v1260_v21 = vmax.f32 %v818_v19, 0.0 }
 0x1b1   : > { %v890_v22 = vpop.f32.mrf.mxu1 }
 0x1b2   : > { %v891_v23 = vadd.f32 %v2395_v13, %v890_v22  ;;  %2569 = vmatmul.mubr.msk.f32.vlgmr.msra.gmra.mxu0 %vm1271_vm3, %v1260_v21 }
 0x1b3   : > { %v2534_v24 = vpop.f32.mrf.mxu1 }
 0x1b4   : > { %v1261_v25 = vmax.f32 %v891_v23, 0.0 }
 0x1b5   : > { %v963_v26 = vpop.f32.mrf.mxu1 }
 0x1b6   : > { %v964_v27 = vadd.f32 %v2395_v13, %v963_v26  ;;  %2571 = vmatprep.mubr.msk.f32.mxu0 %vm1271_vm3, %v1261_v25 }
 0x1b7   : > { %v2539_v28 = vpop.f32.mrf.mxu1 }
 0x1b8   : > { %v1262_v29 = vmax.f32 %v964_v27, 0.0 }
 0x1b9   : > { %v1036_v30 = vpop.f32.mrf.mxu1 }
 0x1ba   : > { %v1037_v31 = vadd.f32 %v2395_v13, %v1036_v30  ;;  %2572 = vmatmul.mubr.msk.f32.gmra.mxu0 %vm1271_vm3, %v1262_v29 }
 0x1bb   : > { %v2544_v33 = vpop.f32.mrf.mxu1 }
 0x1bc   : > { %v1263_v34 = vmax.f32 %v1037_v31, 0.0 }
 0x1bd   : > { %v1109_v35 = vpop.f32.mrf.mxu1 }
 0x1be   : > { %v1110_v36 = vadd.f32 %v2395_v13, %v1109_v35  ;;  %2574 = vmatprep.mubr.msk.f32.mxu0 %vm1271_vm3, %v1263_v34 }
 0x1bf   : > { %v2549_v37 = vpop.f32.mrf.mxu1 }
 0x1c0   : > { %v1264_v38 = vmax.f32 %v1110_v36, 0.0 }
 0x1c1   : > { %v1182_v39 = vpop.f32.mrf.mxu1 }
 0x1c2   : > { %v1183_v40 = vadd.f32 %v2395_v13, %v1182_v39  ;;  %2575 = vmatmul.mubr.msk.f32.gmra.mxu0 %vm1271_vm3, %v1264_v38 }
 0x1c3   : > { %v2554_v41 = vpop.f32.mrf.mxu1 }
 0x1c4   : > { %v1265_v42 = vmax.f32 %v1183_v40, 0.0 }
 0x1c5   : > { %v1255_v43 = vpop.f32.mrf.mxu1 }
 0x1c6   : > { %v1256_v44 = vadd.f32 %v2395_v13, %v1255_v43  ;;  %2577 = vmatprep.mubr.msk.f32.mxu0 %vm1271_vm3, %v1265_v42 }
 0x1c7   : > { %v2559_v45 = vpop.f32.mrf.mxu1 }
 0x1c8   : > { %v1266_v47 = vmax.f32 %v1256_v44, 0.0 }
 0x1ca   : > { %2578 = vmatmul.mubr.msk.f32.gmra.mxu0 %vm1271_vm3, %v1266_v47 }
 0x1cb   : > { %2612 = vmatprep.mubr.msk.f32.mxu0 %vm2760_vm2, %v2759_v32 }
 0x272   : > { %v2570_v63 = vpop.f32.mrf.mxu0 }
 0x274   : > { %v1362_v1 = vpop.f32.mrf.mxu0 }
 0x275   : > { %2581 = vmatpush3.msra.mxu1 %v1362_v1 }
 0x276   : > { %2583 = vmatmul.mubr.msk.f32.vlgmr.msra.gmra.mxu1 %vm473_vm1, %v2970_v46  ;;  %2585 = vmatprep.subr.mxu1 %v2759_v32 }
 0x277   : > { %2586 = vmatpush3.msra.mxu1 %v2570_v63  ;;  %2587 = vmatprep.mubr.msk.f32.mxu1 %vm2760_vm2, %v2759_v32 }
 0x278   : > { %2590 = vmatprep.subr.mxu1 %v2759_v32 }
 0x27a   : > { %v2573_v2 = vpop.f32.mrf.mxu0  ;;  %2588 = vmatmul.mubr.msk.f32.vlgmr.msra.gmra.mxu1 %vm473_vm1, %v2976_v52 }
 0x27b   : > { %2592 = vmatprep.mubr.msk.f32.mxu1 %vm2760_vm2, %v2759_v32 }
 0x27c   : > { %v1372_v4 = vpop.f32.mrf.mxu0 }
 0x27d   : > { %2591 = vmatpush3.msra.mxu1 %v1372_v4 }
 0x27e   : > { %2593 = vmatmul.mubr.msk.f32.vlgmr.msra.gmra.mxu1 %vm473_vm1, %v2984_v57  ;;  %2595 = vmatprep.subr.mxu1 %v2759_v32 }
 0x27f   : > { %2596 = vmatpush3.msra.mxu1 %v2573_v2  ;;  %2597 = vmatprep.mubr.msk.f32.mxu1 %vm2760_vm2, %v2759_v32 }
 0x280   : > { %2600 = vmatprep.subr.mxu1 %v2759_v32 }
 0x282   : > { %v2576_v46 = vpop.f32.mrf.mxu0  ;;  %2598 = vmatmul.mubr.msk.f32.vlgmr.msra.gmra.mxu1 %vm473_vm1, %v2992_v61 }
 0x283   : > { %2602 = vmatprep.mubr.msk.f32.mxu1 %vm2760_vm2, %v2759_v32 }
 0x284   : > { %v1382_v52 = vpop.f32.mrf.mxu0 }
 0x285   : > { %2601 = vmatpush3.msra.mxu1 %v1382_v52 }
 0x286   : > { %2603 = vmatmul.mubr.msk.f32.vlgmr.msra.gmra.mxu1 %vm473_vm1, %v3000_v0  ;;  %2605 = vmatprep.subr.mxu1 %v2759_v32  ;;  %v2120_v0 = vld [vmem:[%s3187_s9 + $0x18] sm:$0xff] }
 0x287   : > { %2606 = vmatpush3.msra.mxu1 %v2576_v46  ;;  %2607 = vmatprep.mubr.msk.f32.mxu1 %vm2760_vm2, %v2759_v32 }
 0x288   : > { %2615 = vmatprep.subr.mxu1 %v2759_v32 }
 0x28a   : > { %v2579_v57 = vpop.f32.mrf.mxu0  ;;  %2608 = vmatmul.mubr.msk.f32.vlgmr.msra.gmra.mxu1 %vm473_vm1, %v3008_v3  ;;  %v2119_v3 = vld [vmem:[%s3187_s9 + $0x10] sm:$0xff] }
 0x28b   : > { %2616 = vmatpush3.msra.mxu1 %v2579_v57  ;;  %2617 = vmatprep.mubr.msk.f32.mxu1 %vm2760_vm2, %v2759_v32 }
 0x28c   : > { %v1392_v61 = vpop.f32.mrf.mxu0 }
 0x28d   : > { %2611 = vmatpush3.msra.mxu0 %v1392_v61 }
 0x28e   : > { %2613 = vmatmul.mubr.msk.f32.vlgmr.msra.gmra.mxu0 %vm473_vm1, %v3016_v6  ;;  %2618 = vmatmul.mubr.msk.f32.vlgmr.msra.gmra.mxu1 %vm473_vm1, %v3024_v8  ;;  %v2117_v6 = vld [vmem:[%s3187_s9] sm:$0xff]  ;;  %v1987_v8 = vpop.permute.xlu1 %1986 }
 0x28f   : > { %2620 = vmatprep.subr.mxu0 %v2759_v32  ;;  %2628 = vmatprep.mubr.msk.f32.mxu0 %vm2760_vm2, %v2759_v32 }
 0x290   : > { %2621 = vmatpush3.msra.mxu0 %v2120_v0 }
 0x291   : > { %2622 = vmatprep.subr.mxu0 %v2759_v32 }
 0x292   : > { %2623 = vmatpush3.msra.mxu0 %v2119_v3  ;;  %v2002_v11 = vpop.permute.xlu1 %2001 }
 0x293   : > { %2624 = vmatprep.subr.mxu0 %v2759_v32 }
 0x294   : > { %2625 = vmatpush3.msra.mxu0 %v2118_v5 }
 0x295   : > { %2626 = vmatprep.subr.mxu0 %v2759_v32 }
 0x296   : > { %2627 = vmatpush3.msra.mxu0 %v2117_v6  ;;  %v2007_v19 = vpop.permute.xlu1 %2006 }
 0x29a   : > { %v2012_v29 = vpop.permute.xlu1 %2011 }
 0x29e   : > { %v2017_v47 = vpop.permute.xlu1 %2016 }
 0x2a2   : > { %v2022_v61 = vpop.permute.xlu1 %2021 }
 0x336   : > { %v1474_v10 = vpop.f32.mrf.mxu1 }
 0x337   : > { %v1475_v12 = vadd.f32 %v2412_v9, %v1474_v10 }
 0x338   : > { %v2584_v13 = vpop.f32.mrf.mxu1 }
 0x339   : > { %v1968_v16 = vmax.f32 %v1475_v12, 0.0 }
 0x33a   : > { %v1544_v14 = vpop.f32.mrf.mxu1 }
 0x33b   : > { %v1545_v15 = vadd.f32 %v2412_v9, %v1544_v14  ;;  %v2024_v23 = vmul.f32 %v1987_v8, %v1968_v16 }
 0x33c   : > { %v2589_v17 = vpop.f32.mrf.mxu1 }
 0x33d   : > { %v1969_v20 = vmax.f32 %v1545_v15, 0.0  ;;  %v2032_v33 = vsel %vm1271_vm3, %v2024_v23, 0.0 }
 0x33e   : > { %v1614_v21 = vpop.f32.mrf.mxu1  ;;  %v2033_v40 = vrot.slane %v2032_v33, 4 }
 0x33f   : > { %v2025_v32 = vmul.f32 %v1992_v18, %v1969_v20  ;;  %v1615_v22 = vadd.f32 %v2412_v9, %v1614_v21 }
 0x340   : > { %v2594_v24 = vpop.f32.mrf.mxu1  ;;  %v2034_v54 = vadd.f32 %v2033_v40, %v2032_v33 }
 0x341   : > { %v2039_v25 = vsel %vm1271_vm3, %v2025_v32, 0.0  ;;  %v1970_v26 = vmax.f32 %v1615_v22, 0.0 }
 0x342   : > { %v2040_v27 = vrot.slane %v2039_v25, 4  ;;  %v1684_v28 = vpop.f32.mrf.mxu1  ;;  %v2035_v57 = vrot.slane %v2034_v54, 2 }
 0x343   : > { %v2026_v30 = vmul.f32 %v1997_v7, %v1970_v26  ;;  %v1685_v31 = vadd.f32 %v2412_v9, %v1684_v28  ;;  %v2093_v26 = vpop.permute.xlu1 %2092 }
 0x344   : > { %v2041_v34 = vadd.f32 %v2040_v27, %v2039_v25  ;;  %v2599_v35 = vpop.f32.mrf.mxu1  ;;  %v2036_v18 = vadd.f32 %v2035_v57, %v2034_v54  ;;  %v2096_v40 = vrot.slane %v2093_v26, 3 }
 0x345   : > { %v2046_v36 = vsel %vm1271_vm3, %v2026_v30, 0.0  ;;  %v1971_v37 = vmax.f32 %v1685_v31, 0.0  ;;  %v2095_v35 = vrot.slane %v2093_v26, 2 }
 0x346   : > { %v2047_v38 = vrot.slane %v2046_v36, 4  ;;  %v1754_v39 = vpop.f32.mrf.mxu1  ;;  %v2042_v43 = vrot.slane %v2041_v34, 2  ;;  %v2037_v31 = vrot.slane %v2036_v18, 1 }
 0x347   : > { %v2027_v41 = vmul.f32 %v2002_v11, %v1971_v37  ;;  %v1755_v42 = vadd.f32 %v2412_v9, %v1754_v39 }
 0x348   : > { %v2048_v44 = vadd.f32 %v2047_v38, %v2046_v36  ;;  %v2604_v45 = vpop.f32.mrf.mxu1  ;;  %v2043_v58 = vadd.f32 %v2042_v43, %v2041_v34  ;;  %v2094_v34 = vrot.slane %v2093_v26, 1 }
 0x349   : > { %v2053_v48 = vsel %vm1271_vm3, %v2027_v41, 0.0  ;;  %v1972_v49 = vmax.f32 %v1755_v42, 0.0  ;;  %v2097_v42 = vrot.slane %v2093_v26, 4 }
 0x34a   : > { %v2049_v50 = vrot.slane %v2048_v44, 2  ;;  %v2054_v51 = vrot.slane %v2053_v48, 4  ;;  %v1824_v53 = vpop.f32.mrf.mxu1  ;;  %v2044_v6 = vrot.slane %v2043_v58, 1 }
 0x34b   : > { %v2028_v55 = vmul.f32 %v2007_v19, %v1972_v49  ;;  %v1825_v56 = vadd.f32 %v2412_v9, %v1824_v53  ;;  %v2098_v49 = vrot.slane %v2093_v26, 5 }
 0x34c   : > { %v2055_v59 = vadd.f32 %v2054_v51, %v2053_v48  ;;  %v2609_v60 = vpop.f32.mrf.mxu1  ;;  %v2050_v62 = vadd.f32 %v2049_v50, %v2048_v44  ;;  %v2045_v23 = vadd.f32 %v2044_v6, %v2043_v58  ;;  %v2038_v48 = vadd.f32 %v2037_v31, %v2036_v18 }
 0x34d   : > { %v2060_v63 = vsel %vm1271_vm3, %v2028_v55, 0.0  ;;  %v1973_v1 = vmax.f32 %v1825_v56, 0.0  ;;  %v2099_v58 = vrot.slane %v2093_v26, 6 }
 0x34e   : > { %v2056_v2 = vrot.slane %v2055_v59, 2  ;;  %v2061_v4 = vrot.slane %v2060_v63, 4  ;;  %v1894_v46 = vpop.f32.mrf.mxu0  ;;  %v1964_v52 = vpop.f32.mrf.mxu1  ;;  %v2051_v12 = vrot.slane %v2050_v62, 1  ;;  %v2110_v41 = vmul.f32 %v2094_v34, %v2045_v23 }
 0x34f   : > { %v2029_v0 = vmul.f32 %v2012_v29, %v1973_v1  ;;  %v1895_v3 = vadd.f32 %v2412_v9, %v1894_v46  ;;  %v1965_v5 = vadd.f32 %v2412_v9, %v1964_v52  ;;  %v2109_v1 = vmul.f32 %v2093_v26, %v2038_v48 }
 0x350   : > { %v2057_v7 = vadd.f32 %v2056_v2, %v2055_v59  ;;  %v2062_v8 = vadd.f32 %v2061_v4, %v2060_v63  ;;  %v2614_v10 = vpop.f32.mrf.mxu0  ;;  %v2619_v11 = vpop.f32.mrf.mxu1  ;;  %v2052_v9 = vadd.f32 %v2051_v12, %v2050_v62  ;;  %v2136_v56 = vrot.slane %v2110_v41, 7 }
 0x351   : > { %v2067_v13 = vsel %vm1271_vm3, %v2029_v0, 0.0  ;;  %v1974_v14 = vmax.f32 %v1895_v3, 0.0  ;;  %v1975_v15 = vmax.f32 %v1965_v5, 0.0  ;;  %v2100_v2 = vrot.slane %v2093_v26, 7 }
 0x352   : > { %v2063_v16 = vrot.slane %v2062_v8, 2  ;;  %v2068_v17 = vrot.slane %v2067_v13, 4  ;;  %v2058_v19 = vrot.slane %v2057_v7, 1  ;;  %v2111_v43 = vmul.f32 %v2095_v35, %v2052_v9 }
 0x353   : > { %v2030_v20 = vmul.f32 %v2017_v47, %v1974_v14  ;;  %v2031_v21 = vmul.f32 %v2022_v61, %v1975_v15  ;;  %v2138_v0 = vsel %vm2137_vm4, %v2136_v56, %v2109_v1  ;;  %v2239_v15 = vlaneseq }
 0x354   : > { %v2064_v32 = vadd.f32 %v2063_v16, %v2062_v8  ;;  %v2069_v22 = vadd.f32 %v2068_v17, %v2067_v13  ;;  %v2059_v33 = vadd.f32 %v2058_v19, %v2057_v7  ;;  %v2139_v63 = vrot.slane %v2111_v43, 6  ;;  %v2421_v16 = vld [vmem:[%s3188_s10] ss:$0 sm:$0xff] }
 0x355   : > { %v2074_v24 = vsel %vm1271_vm3, %v2030_v20, 0.0  ;;  %v2081_v25 = vsel %vm1271_vm3, %v2031_v21, 0.0  ;;  %v2240_v18 = vand.u32 127, %v2239_v15  ;;  %v2244_v20 = vpop.permute.xlu1 %2243 }
 0x356   : > { %v2065_v27 = vrot.slane %v2064_v32, 1  ;;  %v2070_v28 = vrot.slane %v2069_v22, 2  ;;  %v2075_v29 = vrot.slane %v2074_v24, 4  ;;  %v2082_v30 = vrot.slane %v2081_v25, 4 }
 0x357   : > { %v2112_v50 = vmul.f32 %v2096_v40, %v2059_v33  ;;  %v2141_v6 = vsel %vm2140_vm5, %v2139_v63, %v2138_v0  ;;  %vm2245_vm11 = vcmp.eq.s32.totalorder %v2240_v18, %v2244_v20  ;;  %vm2250_vm12 = vcmp.eq.s32.totalorder %v2240_v18, 127 }
 0x358   : > { %v2066_v36 = vadd.f32 %v2065_v27, %v2064_v32  ;;  %v2071_v37 = vadd.f32 %v2070_v28, %v2069_v22  ;;  %v2076_v38 = vadd.f32 %v2075_v29, %v2074_v24  ;;  %v2083_v39 = vadd.f32 %v2082_v30, %v2081_v25 }
 0x359   : > { %v2142_v4 = vrot.slane %v2112_v50, 5 }
 0x35a   : > { %v2072_v44 = vrot.slane %v2071_v37, 1  ;;  %v2077_v45 = vrot.slane %v2076_v38, 2  ;;  %v2084_v47 = vrot.slane %v2083_v39, 2  ;;  %v2113_v51 = vmul.f32 %v2097_v42, %v2066_v36 }
 0x35b   : > { %v2144_v7 = vsel %vm2143_vm6, %v2142_v4, %v2141_v6 }
 0x35c   : > { %v2073_v53 = vadd.f32 %v2072_v44, %v2071_v37  ;;  %v2078_v54 = vadd.f32 %v2077_v45, %v2076_v38  ;;  %v2085_v55 = vadd.f32 %v2084_v47, %v2083_v39  ;;  %v2145_v46 = vrot.slane %v2113_v51, 4 }
 0x35e   : > { %v2114_v59 = vmul.f32 %v2098_v49, %v2073_v53  ;;  %v2079_v60 = vrot.slane %v2078_v54, 1  ;;  %v2086_v62 = vrot.slane %v2085_v55, 1  ;;  %v2147_v8 = vsel %vm2146_vm7, %v2145_v46, %v2144_v7 }
 0x360   : > { %v2080_v52 = vadd.f32 %v2079_v60, %v2078_v54  ;;  %v2087_v57 = vadd.f32 %v2086_v62, %v2085_v55  ;;  %v2148_v61 = vrot.slane %v2114_v59, 3 }
 0x362   : > { %v2115_v3 = vmul.f32 %v2099_v58, %v2080_v52  ;;  %v2116_v5 = vmul.f32 %v2100_v2, %v2087_v57  ;;  %v2150_v12 = vsel %vm2149_vm8, %v2148_v61, %v2147_v8 }
 0x364   : > { %v2151_v10 = vrot.slane %v2115_v3, 2  ;;  %v2154_v11 = vrot.slane %v2116_v5, 1 }
 0x366   : > { %v2153_v13 = vsel %vm2152_vm9, %v2151_v10, %v2150_v12 }
 0x367   : > { %v2156_v14 = vsel %vm2155_vm10, %v2154_v11, %v2153_v13 }
 0x368   : > { %2629 = vmatmul.mubr.msk.f32.vlgmr.msra.gmra.mxu0 %vm1271_vm3, %v2156_v14 }
 0x428   : > { %v2225_v17 = vpop.f32.mrf.mxu0 }
 0x429   : > { %v2226_v19 = vadd.f32 %v2421_v16, %v2225_v17 }
 0x42a   : > { %v2630_v21 = vpop.f32.mrf.mxu0 }
 0x42b   : > { %2229 = vmax.xlane.f32.xlu0 %v2226_v19  ;;  %v2246_v32 = vsel %vm2245_vm11, %v2226_v19, 0.0 }
 0x42f   : > { %2247 = vadd.xlane.f32.xlu0 %v2246_v32 }
 0x4b4   : > { %v2230_v22 = vpop.xlane.xlu0 %2229 }
 0x4b5   : > { %v2231_v23 = vsub.f32 %v2226_v19, %v2230_v22 }
 0x4b7   : > { %v2232_v9 = vmul.f32 1.442695, %v2231_v23 }
 0x4b8   : > { %v2248_v29 = vpop.xlane.xlu0 %2247 }
 0x4b9   : > { %2693 = vpow2.f32 %v2232_v9 }
 0x4c6   : > { %v2694_v24 = vpop.eup %2693 }
 0x4c7   : > { %2234 = vadd.xlane.f32.xlu1 %v2694_v24 }
 0x550   : > { %v2235_v25 = vpop.xlane.xlu1 %2234 }
 0x551   : > { %2695 = vlog2.f32 %v2235_v25 }
 0x55e   : > { %v2696_v26 = vpop.eup %2695 }
 0x55f   : > { %v2237_v27 = vmul.f32 0.6931472, %v2696_v26 }
 0x561   : > { %v2238_v28 = vadd.f32 %v2237_v27, %v2230_v22 }
 0x563   : > { %v2249_v30 = vsub.f32 %v2238_v28, %v2248_v29 }
 0x565   : > { %v2251_v31 = vsel %vm2250_vm12, %v2249_v30, %v2226_v19 }
 0x566   : > { %2252 = vst [vmem:[%s438_s14] sm:$0xff] %v2251_v31 }
 0x567   : > { %2710 = shalt.err (!%p2707_p4)
}
 0x568   : > { %s2711_s22 = scalar_lea.hbm %s3143_s25, 128  ;;  %s2715_s29 = scalar_lea.hbm %s3189_s11, 256 }
 0x569   : > { %p2712_p7 = scmp.ne.s32.totalorder %s3143_s25, %s2711_s22  ;;  %p2716_p10 = scmp.lt.s32.totalorder %s3143_s25, %s3189_s11 }
 0x56a   : > { %p2717_p11 = scmp.lt.s32.totalorder %s2715_s29, %s2711_s22 }
 0x56b   : > { %p2713_p8 = pnand %p2712_p7, %p2861_p5 }
 0x56c   : > { %p2718_p12 = por %p2717_p11, %p2716_p10 }
 0x56d   : > { %p2714_p9 = pneg %p2713_p8 }
 0x56f   : > { %p2719_p13 = pnand %p2718_p12, %p2714_p9 }
 0x571   : > { %2722 = shalt.err (!%p2719_p13)
}
 0x572   : > { %2631 = dma.vmem_to_hbm [thread:$0]  (%p2861_p5), %s2268_s24, 128, %s3143_s25, %s2254_s30  }
 0x573 PF: > { %p2637_p0 = scmp.ge.s32.totalorder %s2757_s20, 2  ;;  %s2279_s12 = sand.u32 1, %s2745_s17  }
 0x574   : > { %s2280_s13 = scalar_lea.sflag [#allocation3], %s2279_s12 }
 0x575   : > { %p2634_p1 = pnand %p2637_p0, %p2865_p6 }
 0x577   : > { %p2635_p2 = pneg %p2634_p1 }
 0x579   : > { %2740 = dma.done.wait (%p2635_p2), %s2280_s13, 128  }
 0x57a   : > { %2742 = vsyncadd (%p2635_p2), %s2280_s13, 4294967168  ;;  %s3193_s16 = sld [smem:[#allocation5_spill]]  ;;  %p21_p3 = scmp.ge.s32.totalorder %s2848_s23, 4  }
 0x57b   : > { %s3194_s17 = smov %s2749_s18  ;;  %s3195_s18 = smov %s2753_s19 }
 0x57c   : > { %s3197_s20 = smov %s2848_s23  ;;  %23 = sbr.rel (!%p21_p3) target bundleno = 3 (0x3), region = 111 }
 0x580   : > { %s3196_s19 = smov %s3193_s16 }
 0x581   :  { %2285 = vsyncpa [#allocation3], 1 }
 0x582   :  { %2287 = vsyncpa [#allocation3 + $0x1], 1 }

</bundles_post_ra>
